<compile_context>
chip_gen: v6e
topology: v6e:2x2x1
jax: 0.10.0
libtpu: 0.0.40
codegen_flags: <defaults>
</compile_context>

<pallas_src>
import functools

import numpy as np
import jax
import jax.numpy as jnp
from jax import lax
from jax.experimental import pallas as pl
from jax.experimental.pallas import tpu as pltpu


def _round_up(x, m):
    return ((x + m - 1) // m) * m


def _dep_kernel(tok_ref, wlin_ref, wbil_ref, wcls_ref, bcls_ref,
                logits_ref, final_ref, *, n_per_batch, root_col):
    """One grid step processes Bblk sentences.

    tok_ref    : [Bblk*Np, H]   bf16   packed token reprs
    wlin_ref   : [H2, H]        bf16   linear.weight (nn.Linear layout)
    wbil_ref   : [H2, H]        bf16   bilinear.weight
    wcls_ref   : [Lp, H]        bf16   classifier.weight padded; row `root_col` = root
    bcls_ref   : [1, Lp]        f32    classifier.bias padded with zeros
    logits_ref : [Bblk*Np, Lp]  f32
    final_ref  : [Bblk, Np, Np] f32
    """
    x = tok_ref[...]                                        # [Bblk*Np, H] bf16
    dn = (((1,), (1,)), ((), ()))                           # contract on last dims

    # Shared-weight matmuls over the packed slab (fills MXU rows).
    final2 = lax.dot_general(x, wlin_ref[...], dn,
                             preferred_element_type=jnp.float32)   # [Bblk*Np, H2]
    pre = lax.dot_general(x, wbil_ref[...], dn,
                          preferred_element_type=jnp.float32)      # [Bblk*Np, H2]
    logits = lax.dot_general(x, wcls_ref[...], dn,
                             preferred_element_type=jnp.float32)   # [Bblk*Np, Lp]
    logits = logits + bcls_ref[...]                                # bias (0 at root col)
    logits_ref[...] = logits.astype(logits_ref.dtype)

    # Diagonal mask computed once per grid step, reused across the batch block.
    np_ = n_per_batch
    rowc = lax.broadcasted_iota(jnp.int32, (np_, np_), 0)
    colc = lax.broadcasted_iota(jnp.int32, (np_, np_), 1)
    diag = rowc == colc

    f2b = final2.astype(jnp.bfloat16)
    prb = pre.astype(jnp.bfloat16)

    bblk = final_ref.shape[0]
    for b in range(bblk):                                   # static unroll (Bblk small)
        sl = slice(b * np_, (b + 1) * np_)
        # final[b] = pre[b] @ final2[b]^T, contraction on shared H2 axis (no .T).
        f = lax.dot_general(prb[sl], f2b[sl], dn,
                            preferred_element_type=jnp.float32)    # [Np, Np]
        # root_score came out of the padded classifier matmul (column `root_col`).
        rs = logits[sl, root_col:root_col + 1]                      # [Np, 1] f32
        f = f + jnp.where(diag, rs, jnp.float32(0.0))
        final_ref[b] = f.astype(final_ref.dtype)


def dep_multitask_classify2(token_reprs, w_linear, w_bilinear, root, w_cls, b_cls):
    """token_reprs: [B, N, H] float32.  Returns (logits [B,N,L], final [B,N,N])."""
    B, N, H = token_reprs.shape
    H2 = w_linear.shape[0]
    L = w_cls.shape[0]

    lane = 128
    Np = _round_up(N, lane)                 # lane/sublane aligned token dim
    Lp = _round_up(L + 1, lane)             # labels + 1 root row, lane-dense logits
    Bblk = max(1, min(B, 256 // Np))        # pack >=256 MXU rows when N allows
    B_pad = _round_up(B, Bblk)

    # Pack / cast inputs (layout plumbing done once in XLA, not per grid step).
    tok = jnp.zeros((B_pad, Np, H), jnp.bfloat16)
    tok = tok.at[:B, :N, :].set(token_reprs.astype(jnp.bfloat16))
    tok2d = tok.reshape(B_pad * Np, H)

    wlin = w_linear.astype(jnp.bfloat16)
    wbil = w_bilinear.astype(jnp.bfloat16)
    wcls = jnp.zeros((Lp, H), jnp.bfloat16)
    wcls = wcls.at[:L, :].set(w_cls.astype(jnp.bfloat16))
    wcls = wcls.at[L, :].set(root.astype(jnp.bfloat16))          # fold root in
    bcls = jnp.zeros((1, Lp), jnp.float32).at[0, :L].set(b_cls.astype(jnp.float32))

    grid = (B_pad // Bblk,)
    kernel = functools.partial(_dep_kernel, n_per_batch=Np, root_col=L)

    logits2d, final_p = pl.pallas_call(
        kernel,
        out_shape=(jax.ShapeDtypeStruct((B_pad * Np, Lp), jnp.float32),
                   jax.ShapeDtypeStruct((B_pad, Np, Np), jnp.float32)),
        grid=grid,
        in_specs=[
            pl.BlockSpec((Bblk * Np, H), lambda b: (b, 0)),   # packed token reprs
            pl.BlockSpec((H2, H), lambda b: (0, 0)),          # linear.weight
            pl.BlockSpec((H2, H), lambda b: (0, 0)),          # bilinear.weight
            pl.BlockSpec((Lp, H), lambda b: (0, 0)),          # classifier.weight + root
            pl.BlockSpec((1, Lp), lambda b: (0, 0)),          # classifier.bias (padded)
        ],
        out_specs=(pl.BlockSpec((Bblk * Np, Lp), lambda b: (b, 0)),
                   pl.BlockSpec((Bblk, Np, Np), lambda b: (b, 0, 0))),
        compiler_params=pltpu.CompilerParams(
            dimension_semantics=("parallel",)),
    )(tok2d, wlin, wbil, wcls, bcls)

    logits = logits2d.reshape(B_pad, Np, Lp)[:B, :N, :L]
    final = final_p[:B, :N, :N]
    return logits, final


def gather_and_pad(sequence_output, label_masks, n_max):
    """Glue: token_reprs = pad_sequence([emb[mask] for ...], padding_value=-1)."""
    def one(emb, mask):
        pos = jnp.cumsum(mask.astype(jnp.int32)) - 1          # target row per True
        idx = jnp.where(mask, pos, n_max)                     # OOB index -> dropped
        out = jnp.full((n_max, emb.shape[-1]), -1.0, emb.dtype)
        return out.at[idx].set(emb, mode="drop")
    return jax.vmap(one)(sequence_output, label_masks)


def _reference_jax(token_reprs, w_linear, w_bilinear, root, w_cls, b_cls):
    linear = w_linear.T                                        # [H, H/2]
    final2 = jnp.einsum("bnh,hg->bng", token_reprs, linear)
    bilinear = w_bilinear.T
    final = jnp.einsum("bnh,hg,bmg->bnm", token_reprs, bilinear, final2)
    root_score = jnp.einsum("bnh,h->bn", token_reprs, root)
    N = final.shape[1]
    eye = jnp.eye(N, dtype=final.dtype)
    final = final + eye[None] * root_score[:, :, None]
    logits = jnp.einsum("bnh,lh->bnl", token_reprs, w_cls) + b_cls
    return logits, final


if __name__ == "__main__":
    # Small synthetic shapes consistent with the module's forward.
    B, S, H, L = 2, 8, 32, 5
    H2 = H // 2

    key = jax.random.PRNGKey(0)
    k_seq, k_lin, k_bil, k_root, k_cw, k_cb = jax.random.split(key, 6)

    # "sequence_output" plays the role of dropout(base_model(input_ids)[0]) in eval.
    sequence_output = jax.random.normal(k_seq, (B, S, H), dtype=jnp.float32)

    # label_masks: which subword positions correspond to real tokens.
    label_masks_np = np.zeros((B, S), dtype=bool)
    label_masks_np[0, [0, 2, 3, 5, 6, 7]] = True   # 6 tokens
    label_masks_np[1, [1, 2, 4, 6]] = True         # 4 tokens
    N = int(label_masks_np.sum(axis=1).max())      # padded token count (6)
    label_masks = jnp.asarray(label_masks_np)

    # Deterministic parameter init (nn.Linear / nn.Parameter shapes).
    w_linear = jax.random.normal(k_lin, (H2, H), dtype=jnp.float32) * 0.1
    w_bilinear = jax.random.normal(k_bil, (H2, H), dtype=jnp.float32) * 0.1
    root = jax.random.uniform(k_root, (H,), dtype=jnp.float32)       # torch.rand(H)
    w_cls = jax.random.normal(k_cw, (L, H), dtype=jnp.float32) * 0.1
    b_cls = jax.random.normal(k_cb, (L,), dtype=jnp.float32) * 0.1

    # Glue: build token_reprs exactly like the mask-gather + pad_sequence(-1).
    token_reprs = gather_and_pad(sequence_output, label_masks, N)

    logits, final = dep_multitask_classify2(
        token_reprs, w_linear, w_bilinear, root, w_cls, b_cls)
    jax.block_until_ready((logits, final))

    ref_logits, ref_final = _reference_jax(
        token_reprs, w_linear, w_bilinear, root, w_cls, b_cls)
    assert logits.shape == (B, N, L) and final.shape == (B, N, N)
    # bf16 matmul operands with f32 accumulation -> loose but meaningful tolerance.
    np.testing.assert_allclose(np.asarray(logits), np.asarray(ref_logits),
                               rtol=5e-2, atol=5e-2)
    np.testing.assert_allclose(np.asarray(final), np.asarray(ref_final),
                               rtol=5e-2, atol=5e-2)

    print("KERNEL_OK")
</pallas_src>

<mosaic_0001>
module attributes {stable_mosaic.version = 11 : i64} {
  func.func @_dep_kernel(%arg0: i32, %arg1: memref<256x32xbf16, #tpu.memory_space<vmem>>, %arg2: memref<16x32xbf16, #tpu.memory_space<vmem>>, %arg3: memref<16x32xbf16, #tpu.memory_space<vmem>>, %arg4: memref<128x32xbf16, #tpu.memory_space<vmem>>, %arg5: memref<1x128xf32, #tpu.memory_space<vmem>>, %arg6: memref<256x128xf32, #tpu.memory_space<vmem>>, %arg7: memref<2x128x128xf32, #tpu.memory_space<vmem>>) attributes {dimension_semantics = [#tpu.dimension_semantics<parallel>], iteration_bounds = array<i64: 1>, scalar_prefetch = 0 : i64, scratch_operands = 0 : i64, tpu.core_type = #tpu.core_type<tc>, window_params = [{transform_indices = @transform_0, window_bounds = array<i64: 256, 32>}, {pipeline_mode = #tpu.pipeline_mode<synchronous>, transform_indices = @transform_1, window_bounds = array<i64: 16, 32>}, {pipeline_mode = #tpu.pipeline_mode<synchronous>, transform_indices = @transform_2, window_bounds = array<i64: 16, 32>}, {pipeline_mode = #tpu.pipeline_mode<synchronous>, transform_indices = @transform_3, window_bounds = array<i64: 128, 32>}, {pipeline_mode = #tpu.pipeline_mode<synchronous>, transform_indices = @transform_4, window_bounds = array<i64: 1, 128>}, {transform_indices = @transform_5, window_bounds = array<i64: 256, 128>}, {transform_indices = @transform_6, window_bounds = array<i64: 2, 128, 128>}]} {
    %c0 = arith.constant 0 : index
    %c0_0 = arith.constant 0 : index
    %0 = vector.load %arg1[%c0, %c0_0] : memref<256x32xbf16, #tpu.memory_space<vmem>>, vector<256x32xbf16>
    %c0_1 = arith.constant 0 : index
    %c0_2 = arith.constant 0 : index
    %1 = vector.load %arg2[%c0_1, %c0_2] : memref<16x32xbf16, #tpu.memory_space<vmem>>, vector<16x32xbf16>
    %cst = arith.constant dense<0.000000e+00> : vector<256x16xf32>
    %2 = tpu.matmul %0, %1, %cst {dimension_numbers = #tpu.dot_dimension_numbers<[1], [1], [0], [0], [0, 0, 1, 0], [], []>} : vector<256x32xbf16>, vector<16x32xbf16>, vector<256x16xf32> -> vector<256x16xf32>
    %c0_3 = arith.constant 0 : index
    %c0_4 = arith.constant 0 : index
    %3 = vector.load %arg3[%c0_3, %c0_4] : memref<16x32xbf16, #tpu.memory_space<vmem>>, vector<16x32xbf16>
    %cst_5 = arith.constant dense<0.000000e+00> : vector<256x16xf32>
    %4 = tpu.matmul %0, %3, %cst_5 {dimension_numbers = #tpu.dot_dimension_numbers<[1], [1], [0], [0], [0, 0, 1, 0], [], []>} : vector<256x32xbf16>, vector<16x32xbf16>, vector<256x16xf32> -> vector<256x16xf32>
    %c0_6 = arith.constant 0 : index
    %c0_7 = arith.constant 0 : index
    %5 = vector.load %arg4[%c0_6, %c0_7] : memref<128x32xbf16, #tpu.memory_space<vmem>>, vector<128x32xbf16>
    %cst_8 = arith.constant dense<0.000000e+00> : vector<256x128xf32>
    %6 = tpu.matmul %0, %5, %cst_8 {dimension_numbers = #tpu.dot_dimension_numbers<[1], [1], [0], [0], [0, 0, 1, 0], [], []>} : vector<256x32xbf16>, vector<128x32xbf16>, vector<256x128xf32> -> vector<256x128xf32>
    %c0_9 = arith.constant 0 : index
    %c0_10 = arith.constant 0 : index
    %7 = vector.load %arg5[%c0_9, %c0_10] : memref<1x128xf32, #tpu.memory_space<vmem>>, vector<1x128xf32>
    %8 = vector.broadcast %7 : vector<1x128xf32> to vector<256x128xf32>
    %9 = arith.addf %6, %8 : vector<256x128xf32>
    %c0_11 = arith.constant 0 : index
    %c0_12 = arith.constant 0 : index
    %10 = vector.load %arg6[%c0_11, %c0_12] : memref<256x128xf32, #tpu.memory_space<vmem>>, vector<256x128xf32>
    tpu.vector_store %arg6[%c0_11, %c0_12], %9 {strides = array<i32>} : memref<256x128xf32, #tpu.memory_space<vmem>>, vector<256x128xf32>,
    %11 = tpu.iota {dimensions = array<i32: 0>} : vector<128x128xi32>
    %12 = tpu.iota {dimensions = array<i32: 1>} : vector<128x128xi32>
    %13 = arith.cmpi eq, %11, %12 : vector<128x128xi32>
    %14 = arith.truncf %2 : vector<256x16xf32> to vector<256x16xbf16>
    %15 = arith.truncf %4 : vector<256x16xf32> to vector<256x16xbf16>
    %16 = vector.extract_strided_slice %15 {offsets = [0, 0], sizes = [128, 16], strides = [1, 1]} : vector<256x16xbf16> to vector<128x16xbf16>
    %17 = vector.extract_strided_slice %14 {offsets = [0, 0], sizes = [128, 16], strides = [1, 1]} : vector<256x16xbf16> to vector<128x16xbf16>
    %cst_13 = arith.constant dense<0.000000e+00> : vector<128x128xf32>
    %18 = tpu.matmul %16, %17, %cst_13 {dimension_numbers = #tpu.dot_dimension_numbers<[1], [1], [0], [0], [0, 0, 1, 0], [], []>} : vector<128x16xbf16>, vector<128x16xbf16>, vector<128x128xf32> -> vector<128x128xf32>
    %19 = vector.extract_strided_slice %9 {offsets = [0, 5], sizes = [128, 1], strides = [1, 1]} : vector<256x128xf32> to vector<128x1xf32>
    %cst_14 = arith.constant 0.000000e+00 : f32
    %20 = vector.shape_cast %19 : vector<128x1xf32> to vector<128x1xf32>
    %21 = vector.broadcast %20 : vector<128x1xf32> to vector<128x128xf32>
    %22 = vector.broadcast %cst_14 : f32 to vector<128x128xf32>
    %23 = arith.select %13, %21, %22 : vector<128x128xi1>, vector<128x128xf32>
    %24 = arith.addf %18, %23 : vector<128x128xf32>
    %c0_15 = arith.constant 0 : index
    %c0_16 = arith.constant 0 : index
    %c0_17 = arith.constant 0 : index
    %25 = vector.load %arg7[%c0_15, %c0_16, %c0_17] : memref<2x128x128xf32, #tpu.memory_space<vmem>>, vector<1x128x128xf32>
    %26 = vector.shape_cast %25 : vector<1x128x128xf32> to vector<128x128xf32>
    %27 = vector.shape_cast %24 : vector<128x128xf32> to vector<1x128x128xf32>
    tpu.vector_store %arg7[%c0_15, %c0_16, %c0_17], %27 {strides = array<i32>} : memref<2x128x128xf32, #tpu.memory_space<vmem>>, vector<1x128x128xf32>,
    %28 = vector.extract_strided_slice %15 {offsets = [128, 0], sizes = [128, 16], strides = [1, 1]} : vector<256x16xbf16> to vector<128x16xbf16>
    %29 = vector.extract_strided_slice %14 {offsets = [128, 0], sizes = [128, 16], strides = [1, 1]} : vector<256x16xbf16> to vector<128x16xbf16>
    %cst_18 = arith.constant dense<0.000000e+00> : vector<128x128xf32>
    %30 = tpu.matmul %28, %29, %cst_18 {dimension_numbers = #tpu.dot_dimension_numbers<[1], [1], [0], [0], [0, 0, 1, 0], [], []>} : vector<128x16xbf16>, vector<128x16xbf16>, vector<128x128xf32> -> vector<128x128xf32>
    %31 = vector.extract_strided_slice %9 {offsets = [128, 5], sizes = [128, 1], strides = [1, 1]} : vector<256x128xf32> to vector<128x1xf32>
    %cst_19 = arith.constant 0.000000e+00 : f32
    %32 = vector.shape_cast %31 : vector<128x1xf32> to vector<128x1xf32>
    %33 = vector.broadcast %32 : vector<128x1xf32> to vector<128x128xf32>
    %34 = vector.broadcast %cst_19 : f32 to vector<128x128xf32>
    %35 = arith.select %13, %33, %34 : vector<128x128xi1>, vector<128x128xf32>
    %36 = arith.addf %30, %35 : vector<128x128xf32>
    %c1 = arith.constant 1 : index
    %c0_20 = arith.constant 0 : index
    %c0_21 = arith.constant 0 : index
    %37 = vector.load %arg7[%c1, %c0_20, %c0_21] : memref<2x128x128xf32, #tpu.memory_space<vmem>>, vector<1x128x128xf32>
    %38 = vector.shape_cast %37 : vector<1x128x128xf32> to vector<128x128xf32>
    %39 = vector.shape_cast %36 : vector<128x128xf32> to vector<1x128x128xf32>
    tpu.vector_store %arg7[%c1, %c0_20, %c0_21], %39 {strides = array<i32>} : memref<2x128x128xf32, #tpu.memory_space<vmem>>, vector<1x128x128xf32>,
    return
  }
  func.func @transform_0(%arg0: i32) -> (i32, i32) {
    %c0_i32 = arith.constant 0 : i32
    %c0_i32_0 = arith.constant 0 : i32
    return %arg0, %c0_i32 : i32, i32
  }
  func.func @transform_1(%arg0: i32) -> (i32, i32) {
    %c0_i32 = arith.constant 0 : i32
    %c0_i32_0 = arith.constant 0 : i32
    %c0_i32_1 = arith.constant 0 : i32
    return %c0_i32, %c0_i32_0 : i32, i32
  }
  func.func @transform_2(%arg0: i32) -> (i32, i32) {
    %c0_i32 = arith.constant 0 : i32
    %c0_i32_0 = arith.constant 0 : i32
    %c0_i32_1 = arith.constant 0 : i32
    return %c0_i32, %c0_i32_0 : i32, i32
  }
  func.func @transform_3(%arg0: i32) -> (i32, i32) {
    %c0_i32 = arith.constant 0 : i32
    %c0_i32_0 = arith.constant 0 : i32
    %c0_i32_1 = arith.constant 0 : i32
    return %c0_i32, %c0_i32_0 : i32, i32
  }
  func.func @transform_4(%arg0: i32) -> (i32, i32) {
    %c0_i32 = arith.constant 0 : i32
    %c0_i32_0 = arith.constant 0 : i32
    %c0_i32_1 = arith.constant 0 : i32
    return %c0_i32, %c0_i32_0 : i32, i32
  }
  func.func @transform_5(%arg0: i32) -> (i32, i32) {
    %c0_i32 = arith.constant 0 : i32
    %c0_i32_0 = arith.constant 0 : i32
    return %arg0, %c0_i32 : i32, i32
  }
  func.func @transform_6(%arg0: i32) -> (i32, i32, i32) {
    %c0_i32 = arith.constant 0 : i32
    %c0_i32_0 = arith.constant 0 : i32
    %c0_i32_1 = arith.constant 0 : i32
    return %arg0, %c0_i32, %c0_i32_0 : i32, i32, i32
  }
}

</mosaic_0001>

<bundles_post_ra>
// kernel: tpu_custom_call.1
= control target key start
LH: loop header
LB: loop body
LE: loop exit
PB: predicated region body
PF: predicated region fallthrough
CT: control target
= control target key end

     0   :  { %12 = vsyncpa [#allocation3], 0  ;;  %vm144_vm0 = vcmask 261120   ;;  %s2595_s0 = inlined_call_operand.vmem [shape: bf16[256,32], index: 0, kind: input, shape index: {}]   ;;  %s2596_s1 = inlined_call_operand.vmem [shape: bf16[16,32], index: 1, kind: input, shape index: {}]   ;;  %s2597_s2 = inlined_call_operand.vmem [shape: bf16[16,32], index: 2, kind: input, shape index: {}]   ;;  %s2598_s3 = inlined_call_operand.vmem [shape: bf16[128,32], index: 3, kind: input, shape index: {}]   ;;  %s2599_s4 = inlined_call_operand.vmem [shape: f32[1,128], index: 4, kind: input, shape index: {}]   ;;  %s2600_s5 = inlined_call_operand.hbm [shape: f32[256,128], index: 5, kind: output, shape index: {0}]   ;;  %s2601_s6 = inlined_call_operand.hbm [shape: f32[2,128,128], index: 6, kind: output, shape index: {1}]  }
   0x1   :  { %v1841_v0 = vld [vmem:[%s2596_s1] sm:$0xff]   ;;  %v1968_v3 = vld [vmem:[%s2595_s0 + $0x8] sm:$0xff]   ;;  %v1973_v4 = vld [vmem:[%s2595_s0 + $0x10] sm:$0xff]  }
   0x2   :  { %v1957_v1 = vld [vmem:[%s2595_s0] sm:$0xff]   ;;  %1800 = vmatprep.subr.msk.bf16.mxu0 %vm144_vm0, %v1841_v0  ;;  %v194_v2 = vsel %vm144_vm0, %v1841_v0, 0  ;;  %v1982_v5 = vld [vmem:[%s2595_s0 + $0x18] sm:$0xff]   ;;  %v1859_v9 = vld [vmem:[%s2598_s3 + $0x30] sm:$0xff]  }
   0x3   :  { %1605 = vmatpush3.bf16.xpose.msra.mxu0 %v194_v2  ;;  %1606 = vmatprep.mubr.msk.bf16.mxu0 %vm144_vm0, %v1957_v1  ;;  %v1987_v6 = vld [vmem:[%s2595_s0 + $0x20] sm:$0xff]   ;;  %v1856_v7 = vld [vmem:[%s2598_s3 + $0x38] sm:$0xff]   ;;  %v2008_v11 = vld [vmem:[%s2595_s0 + $0x28] sm:$0xff]   ;;  %v610_v14 = vsel %vm144_vm0, %v1859_v9, 0 }
   0x4   :  { %1640 = vmatprep.mubr.msk.bf16.mxu1 %vm144_vm0, %v1957_v1  ;;  %1802 = vmatprep.subr.msk.bf16.mxu0 %vm144_vm0, %v1856_v7  ;;  %v613_v8 = vsel %vm144_vm0, %v1856_v7, 0  ;;  %v1861_v10 = vld [vmem:[%s2597_s2] sm:$0xff]   ;;  %v2015_v13 = vld [vmem:[%s2595_s0 + $0x30] sm:$0xff]   ;;  %v1860_v15 = vld [vmem:[%s2598_s3 + $0x28] sm:$0xff]  }
   0x5   :  { %1801 = vmatprep.subr.msk.bf16.mxu1 %vm144_vm0, %v1861_v10  ;;  %v365_v12 = vsel %vm144_vm0, %v1861_v10, 0 }
   0x6   :  { %1639 = vmatpush3.bf16.xpose.msra.mxu1 %v365_v12 }
   0xa   :  { %1607 = vmatmul.mubr.msk.bf16.vlgmr.msra.gmra.mxu0 %vm144_vm0, %v1968_v3 }
   0xb   :  { %1610 = vmatprep.mubr.msk.bf16.mxu0 %vm144_vm0, %v1973_v4  ;;  %1673 = vmatpush3.bf16.xpose.msra.mxu0 %v613_v8 }
   0xc   :  { %1803 = vmatprep.subr.msk.bf16.mxu0 %vm144_vm0, %v1859_v9 }
  0x12   :  { %1611 = vmatmul.mubr.msk.bf16.gmra.mxu0 %vm144_vm0, %v1982_v5 }
  0x13   :  { %1614 = vmatprep.mubr.msk.bf16.mxu0 %vm144_vm0, %v1987_v6 }
  0x1a   :  { %1615 = vmatmul.mubr.msk.bf16.gmra.mxu0 %vm144_vm0, %v2008_v11 }
  0x1b   :  { %13 = vsyncpa [#allocation5], 0  ;;  %1618 = vmatprep.mubr.msk.bf16.mxu0 %vm144_vm0, %v2015_v13  ;;  %1675 = vmatpush3.bf16.xpose.msra.mxu0 %v610_v14  ;;  %v1849_v16 = vld [vmem:[%s2595_s0 + $0x38] sm:$0xff]   ;;  %v1850_v17 = vld [vmem:[%s2595_s0 + $0x40] sm:$0xff]   ;;  %v607_v18 = vsel %vm144_vm0, %v1860_v15, 0  ;;  %v1911_v36 = vmov 5  }
  0x1c   :  { %1804 = vmatprep.subr.msk.bf16.mxu0 %vm144_vm0, %v1860_v15  ;;  %1641 = vmatmul.mubr.msk.bf16.vlgmr.msra.gmra.mxu1 %vm144_vm0, %v1968_v3  ;;  %v1862_v19 = vld [vmem:[%s2598_s3 + $0x20] sm:$0xff]   ;;  %v1851_v20 = vld [vmem:[%s2595_s0 + $0x48] sm:$0xff]   ;;  %v1852_v21 = vld [vmem:[%s2595_s0 + $0x50] sm:$0xff]   ;;  %vm971_vm1 = vcmask 130048  }
  0x1d   :  { %1644 = vmatprep.mubr.msk.bf16.mxu1 %vm144_vm0, %v1973_v4  ;;  %v604_v22 = vsel %vm144_vm0, %v1862_v19, 0  ;;  %v1863_v23 = vld [vmem:[%s2598_s3 + $0x18] sm:$0xff]   ;;  %v1854_v25 = vld [vmem:[%s2595_s0 + $0x60] sm:$0xff]   ;;  %v1864_v27 = vld [vmem:[%s2598_s3 + $0x10] sm:$0xff]   ;;  %1840 = vset.pattern.permute.xlu0 %v1911_v36 }
  0x1e   :  { %v1853_v24 = vld [vmem:[%s2595_s0 + $0x58] sm:$0xff]   ;;  %v601_v26 = vsel %vm144_vm0, %v1863_v23, 0  ;;  %v1855_v28 = vld [vmem:[%s2595_s0 + $0x68] sm:$0xff]   ;;  %v1857_v29 = vld [vmem:[%s2595_s0 + $0x70] sm:$0xff]   ;;  %v598_v30 = vsel %vm144_vm0, %v1864_v27, 0  ;;  %1839 = vset.pattern.permute.xlu1 %v1911_v36 }
  0x1f   :  { %v1865_v31 = vld [vmem:[%s2598_s3 + $0x8] sm:$0xff]   ;;  %v1858_v32 = vld [vmem:[%s2595_s0 + $0x78] sm:$0xff]   ;;  %v1866_v34 = vld [vmem:[%s2598_s3] sm:$0xff]  }
  0x20   :  { %v595_v33 = vsel %vm144_vm0, %v1865_v31, 0  ;;  %v592_v35 = vsel %vm144_vm0, %v1866_v34, 0 }
  0x22   :  { %1619 = vmatmul.mubr.msk.bf16.gmra.mxu0 %vm144_vm0, %v1849_v16 }
  0x23   :  { %1622 = vmatprep.mubr.msk.bf16.mxu0 %vm144_vm0, %v1850_v17  ;;  %1677 = vmatpush3.bf16.xpose.msra.mxu0 %v607_v18 }
  0x24   :  { %1805 = vmatprep.subr.msk.bf16.mxu0 %vm144_vm0, %v1862_v19  ;;  %1645 = vmatmul.mubr.msk.bf16.gmra.mxu1 %vm144_vm0, %v1982_v5 }
  0x25   :  { %1648 = vmatprep.mubr.msk.bf16.mxu1 %vm144_vm0, %v1987_v6 }
  0x2a   :  { %1623 = vmatmul.mubr.msk.bf16.gmra.mxu0 %vm144_vm0, %v1851_v20 }
  0x2b   :  { %1626 = vmatprep.mubr.msk.bf16.mxu0 %vm144_vm0, %v1852_v21  ;;  %1679 = vmatpush3.bf16.xpose.msra.mxu0 %v604_v22 }
  0x2c   :  { %1806 = vmatprep.subr.msk.bf16.mxu0 %vm144_vm0, %v1863_v23  ;;  %1649 = vmatmul.mubr.msk.bf16.gmra.mxu1 %vm144_vm0, %v2008_v11 }
  0x2d   :  { %1652 = vmatprep.mubr.msk.bf16.mxu1 %vm144_vm0, %v2015_v13 }
  0x32   :  { %1627 = vmatmul.mubr.msk.bf16.gmra.mxu0 %vm144_vm0, %v1853_v24 }
  0x33   :  { %1630 = vmatprep.mubr.msk.bf16.mxu0 %vm144_vm0, %v1854_v25  ;;  %1681 = vmatpush3.bf16.xpose.msra.mxu0 %v601_v26 }
  0x34   :  { %1807 = vmatprep.subr.msk.bf16.mxu0 %vm144_vm0, %v1864_v27  ;;  %1653 = vmatmul.mubr.msk.bf16.gmra.mxu1 %vm144_vm0, %v1849_v16 }
  0x35   :  { %1656 = vmatprep.mubr.msk.bf16.mxu1 %vm144_vm0, %v1850_v17 }
  0x3a   :  { %1631 = vmatmul.mubr.msk.bf16.gmra.mxu0 %vm144_vm0, %v1855_v28 }
  0x3b   :  { %1634 = vmatprep.mubr.msk.bf16.mxu0 %vm144_vm0, %v1857_v29  ;;  %1683 = vmatpush3.bf16.xpose.msra.mxu0 %v598_v30 }
  0x3c   :  { %1808 = vmatprep.subr.msk.bf16.mxu0 %vm144_vm0, %v1865_v31  ;;  %1657 = vmatmul.mubr.msk.bf16.gmra.mxu1 %vm144_vm0, %v1851_v20 }
  0x3d   :  { %1660 = vmatprep.mubr.msk.bf16.mxu1 %vm144_vm0, %v1852_v21 }
  0x42   :  { %1635 = vmatmul.mubr.msk.bf16.gmra.mxu0 %vm144_vm0, %v1858_v32 }
  0x43   :  { %1685 = vmatpush3.bf16.xpose.msra.mxu0 %v595_v33  ;;  %1688 = vmatprep.mubr.msk.bf16.mxu0 %vm144_vm0, %v1957_v1 }
  0x44   :  { %1809 = vmatprep.subr.msk.bf16.mxu0 %vm144_vm0, %v1866_v34  ;;  %1661 = vmatmul.mubr.msk.bf16.gmra.mxu1 %vm144_vm0, %v1853_v24 }
  0x45   :  { %1664 = vmatprep.mubr.msk.bf16.mxu1 %vm144_vm0, %v1854_v25 }
  0x4b   :  { %1687 = vmatpush3.bf16.xpose.msra.mxu0 %v592_v35 }
  0x4c   :  { %1665 = vmatmul.mubr.msk.bf16.gmra.mxu1 %vm144_vm0, %v1855_v28 }
  0x4d   :  { %1668 = vmatprep.mubr.msk.bf16.mxu1 %vm144_vm0, %v1857_v29 }
  0x52   :  { %1689 = vmatmul.mubr.msk.bf16.vlgmr.msra.gmra.mxu0 %vm144_vm0, %v1968_v3 }
  0x53   :  { %1692 = vmatprep.mubr.msk.bf16.mxu0 %vm144_vm0, %v1973_v4 }
  0x54   :  { %1669 = vmatmul.mubr.msk.bf16.gmra.mxu1 %vm144_vm0, %v1858_v32 }
  0x5a   :  { %1693 = vmatmul.mubr.msk.bf16.gmra.mxu0 %vm144_vm0, %v1982_v5 }
  0x5b   :  { %1696 = vmatprep.mubr.msk.bf16.mxu0 %vm144_vm0, %v1987_v6 }
  0x62   :  { %1697 = vmatmul.mubr.msk.bf16.gmra.mxu0 %vm144_vm0, %v2008_v11 }
  0x63   :  { %1700 = vmatprep.mubr.msk.bf16.mxu0 %vm144_vm0, %v2015_v13 }
  0x6a   :  { %1701 = vmatmul.mubr.msk.bf16.gmra.mxu0 %vm144_vm0, %v1849_v16 }
  0x6b   :  { %1704 = vmatprep.mubr.msk.bf16.mxu0 %vm144_vm0, %v1850_v17 }
  0x72   :  { %1705 = vmatmul.mubr.msk.bf16.gmra.mxu0 %vm144_vm0, %v1851_v20 }
  0x73   :  { %1708 = vmatprep.mubr.msk.bf16.mxu0 %vm144_vm0, %v1852_v21 }
  0x7a   :  { %1709 = vmatmul.mubr.msk.bf16.gmra.mxu0 %vm144_vm0, %v1853_v24 }
  0x7b   :  { %1712 = vmatprep.mubr.msk.bf16.mxu0 %vm144_vm0, %v1854_v25 }
  0x82   :  { %1713 = vmatmul.mubr.msk.bf16.gmra.mxu0 %vm144_vm0, %v1855_v28 }
  0x83   :  { %1716 = vmatprep.mubr.msk.bf16.mxu0 %vm144_vm0, %v1857_v29 }
  0x8a   :  { %1717 = vmatmul.mubr.msk.bf16.gmra.mxu0 %vm144_vm0, %v1858_v32 }
  0xca   :  { %v1608_v37 = vpop.f32.mrf.mxu0 }
  0xcc   :  { %v230_v38 = vpop.f32.mrf.mxu0 }
  0xce   :  { %v1609_v39 = vpop.f32.mrf.mxu0 }
  0xcf   :  { %v2132_v40 = vpack.c.bf16 %v1609_v39, %v1608_v37 }
  0xd0   :  { %v233_v41 = vpop.f32.mrf.mxu0 }
  0xd1   :  { %v2134_v42 = vpack.c.bf16 %v233_v41, %v230_v38 }
  0xd2   :  { %v2136_v43 = vpop.f32.mrf.mxu0 }
  0xd4   :  { %v2138_v44 = vpop.f32.mrf.mxu0 }
  0xd6   :  { %v2140_v45 = vpop.f32.mrf.mxu0 }
  0xd7   :  { %v846_v35 = vpack.c.bf16 %v2140_v45, %v2136_v43 }
  0xd8   :  { %v2142_v46 = vpop.f32.mrf.mxu0 }
  0xd9   :  { %v1006_v45 = vsel %vm971_vm1, %v846_v35, 0 }
  0xda   :  { %v1616_v47 = vpop.f32.mrf.mxu0 }
  0xdc   :  { %v262_v48 = vpop.f32.mrf.mxu0  ;;  %v2144_v50 = vpop.f32.mrf.mxu1 }
  0xde   :  { %v1617_v49 = vpop.f32.mrf.mxu0  ;;  %v401_v52 = vpop.f32.mrf.mxu1 }
  0xdf   :  { %v848_v12 = vpack.c.bf16 %v1617_v49, %v1616_v47 }
  0xe0   :  { %v265_v51 = vpop.f32.mrf.mxu0  ;;  %v2146_v54 = vpop.f32.mrf.mxu1 }
  0xe1   :  { %v860_v55 = vpack.c.bf16 %v2146_v54, %v2144_v50  ;;  %v1012_v24 = vsel %vm971_vm1, %v848_v12, 0  ;;  %v847_v25 = vpack.c.bf16 %v265_v51, %v262_v48 }
  0xe2   :  { %v1620_v53 = vpop.f32.mrf.mxu0  ;;  %v404_v57 = vpop.f32.mrf.mxu1 }
  0xe3   :  { %v859_v58 = vpack.c.bf16 %v404_v57, %v401_v52  ;;  %v1009_v36 = vsel %vm971_vm1, %v847_v25, 0  ;;  %v845_v52 = vpack.c.bf16 %v2142_v46, %v2138_v44  ;;  %v2237_v46 = vld [vmem:[%s2599_s4] ss:$0 sm:$0xff]  ;;  %s1912_s4 = smov [#allocation2]  }
  0xe4   :  { %v278_v56 = vpop.f32.mrf.mxu0  ;;  %v2150_v60 = vpop.f32.mrf.mxu1  ;;  %s1396_s21 = sshll.u32 %s1912_s4, 4  ;;  %s1397_s21 = int_to_ptr.vmem [resolvable:$true] %s1396_s21 }
  0xe5   :  { %1736 = vmatprep.mubr.msk.bf16.mxu1 %vm971_vm1, %v859_v58  ;;  %v1003_v58 = vsel %vm971_vm1, %v845_v52, 0  ;;  %s1867_s22 = scalar_lea.vmem %s1397_s21, 4096  ;;  %p1872_p1 = scmp.lt.s32.totalorder %s1397_s21, %s1397_s21 }
  0xe6   :  { %v1621_v59 = vpop.f32.mrf.mxu0  ;;  %v2153_v63 = vpop.f32.mrf.mxu1  ;;  %p1868_p0 = scmp.ne.s32.totalorder %s1397_s21, %s1867_s22  ;;  %p1873_p2 = scmp.lt.s32.totalorder %s1867_s22, %s1867_s22 }
  0xe7   :  { %v850_v61 = vpack.c.bf16 %v1621_v59, %v1620_v53 }
  0xe8   :  { %v281_v62 = vpop.f32.mrf.mxu0  ;;  %v2157_v3 = vpop.f32.mrf.mxu1  ;;  %p1874_p3 = por %p1873_p2, %p1872_p1 }
  0xe9   :  { %v1018_v0 = vsel %vm971_vm1, %v850_v61, 0  ;;  %v849_v1 = vpack.c.bf16 %v281_v62, %v278_v56  ;;  %1810 = vmatprep.subr.msk.bf16.mxu1 %vm971_vm1, %v850_v61  ;;  %v862_v4 = vpack.c.bf16 %v2157_v3, %v2150_v60 }
  0xea   :  { %v1624_v2 = vpop.f32.mrf.mxu0  ;;  %1721 = vmatpush3.bf16.xpose.msra.mxu1 %v1018_v0  ;;  %v2162_v6 = vpop.f32.mrf.mxu1  ;;  %p1875_p4 = pnand %p1874_p3, %p1868_p0 }
  0xeb   :  { %1811 = vmatprep.subr.msk.bf16.mxu1 %vm971_vm1, %v849_v1  ;;  %v1015_v13 = vsel %vm971_vm1, %v849_v1, 0 }
  0xec   :  { %v294_v5 = vpop.f32.mrf.mxu0  ;;  %v2164_v8 = vpop.f32.mrf.mxu1 }
  0xee   :  { %v1625_v7 = vpop.f32.mrf.mxu0  ;;  %v2168_v11 = vpop.f32.mrf.mxu1 }
  0xef   :  { %v2166_v9 = vpack.c.bf16 %v1625_v7, %v1624_v2 }
  0xf0   :  { %v297_v10 = vpop.f32.mrf.mxu0  ;;  %v2175_v16 = vpop.f32.mrf.mxu1 }
  0xf1   :  { %v2171_v14 = vpack.c.bf16 %v297_v10, %v294_v5  ;;  %v864_v17 = vpack.c.bf16 %v2175_v16, %v2164_v8 }
  0xf2   :  { %v2173_v15 = vpop.f32.mrf.mxu0  ;;  %1723 = vmatpush3.bf16.xpose.msra.mxu1 %v1015_v13  ;;  %v2182_v19 = vpop.f32.mrf.mxu1 }
  0xf3   :  { %1812 = vmatprep.subr.msk.bf16.mxu1 %vm971_vm1, %v848_v12  ;;  %v1000_v12 = vsel %vm971_vm1, %v2132_v40, 0 }
  0xf4   :  { %v2180_v18 = vpop.f32.mrf.mxu0  ;;  %v2186_v21 = vpop.f32.mrf.mxu1 }
  0xf6   :  { %v2184_v20 = vpop.f32.mrf.mxu0  ;;  %v2190_v23 = vpop.f32.mrf.mxu1 }
  0xf8   :  { %v2188_v22 = vpop.f32.mrf.mxu0  ;;  %v2193_v27 = vpop.f32.mrf.mxu1 }
  0xf9   :  { %v866_v28 = vpack.c.bf16 %v2193_v27, %v2186_v21 }
  0xfa   :  { %v1632_v26 = vpop.f32.mrf.mxu0  ;;  %1725 = vmatpush3.bf16.xpose.msra.mxu1 %v1012_v24  ;;  %v2198_v30 = vpop.f32.mrf.mxu1 }
  0xfb   :  { %1813 = vmatprep.subr.msk.bf16.mxu1 %vm971_vm1, %v847_v25 }
  0xfc   :  { %v326_v29 = vpop.f32.mrf.mxu0  ;;  %v2200_v32 = vpop.f32.mrf.mxu1 }
  0xfe   :  { %v1633_v31 = vpop.f32.mrf.mxu0  ;;  %v465_v34 = vpop.f32.mrf.mxu1 }
  0xff   :  { %v2228_v57 = vpack.c.bf16 %v1633_v31, %v1632_v26 }
 0x100   :  { %v329_v33 = vpop.f32.mrf.mxu0  ;;  %v2205_v38 = vpop.f32.mrf.mxu1 }
 0x101   :  { %v868_v39 = vpack.c.bf16 %v2205_v38, %v2200_v32  ;;  %v2247_v2 = vpack.c.bf16 %v329_v33, %v326_v29  ;;  %v2251_v5 = vsel %vm971_vm1, %v2228_v57, 0 }
 0x102   :  { %v1636_v37 = vpop.f32.mrf.mxu0  ;;  %1727 = vmatpush3.bf16.xpose.msra.mxu1 %v1009_v36  ;;  %v468_v47 = vpop.f32.mrf.mxu1 }
 0x103   :  { %1814 = vmatprep.subr.msk.bf16.mxu1 %vm971_vm1, %v846_v35  ;;  %v867_v48 = vpack.c.bf16 %v468_v47, %v465_v34  ;;  %v997_v34 = vsel %vm971_vm1, %v2134_v42, 0  ;;  %v2269_v35 = vpack.c.bf16 %v2184_v20, %v2173_v15  ;;  %v2273_v36 = vsel %vm971_vm1, %v2247_v2, 0 }
 0x104   :  { %v342_v41 = vpop.f32.mrf.mxu0 }
 0x105   :  { %1768 = vmatprep.mubr.msk.bf16.mxu0 %vm971_vm1, %v867_v48 }
 0x106   :  { %v1637_v49 = vpop.f32.mrf.mxu0 }
 0x107   :  { %v2210_v51 = vpack.c.bf16 %v1637_v49, %v1636_v37 }
 0x108   :  { %v345_v43 = vpop.f32.mrf.mxu0 }
 0x109   :  { %1818 = vmatprep.subr.msk.bf16.mxu0 %vm971_vm1, %v2210_v51  ;;  %v2220_v53 = vsel %vm971_vm1, %v2210_v51, 0  ;;  %v2222_v56 = vpack.c.bf16 %v345_v43, %v342_v41  ;;  %v2277_v41 = vpop.f32.mrf.mxu1 }
 0x10a   :  { %1729 = vmatpush3.bf16.xpose.msra.mxu1 %v1006_v45  ;;  %1753 = vmatpush3.bf16.xpose.msra.mxu0 %v2220_v53  ;;  %v861_v45 = vpack.c.bf16 %v2162_v6, %v2153_v63 }
 0x10b   :  { %1815 = vmatprep.subr.msk.bf16.mxu1 %vm971_vm1, %v845_v52  ;;  %1820 = vmatprep.subr.msk.bf16.mxu0 %vm971_vm1, %v2222_v56  ;;  %v2232_v44 = vsel %vm971_vm1, %v2222_v56, 0  ;;  %v2285_v48 = vpop.f32.mrf.mxu1 }
 0x10d   :  { %v2305_v63 = vpop.f32.mrf.mxu1 }
 0x10e   :  { %v870_v32 = vpack.c.bf16 %v2305_v63, %v2277_v41 }
 0x112   :  { %1731 = vmatpush3.bf16.xpose.msra.mxu1 %v1003_v58  ;;  %1755 = vmatpush3.bf16.xpose.msra.mxu0 %v2232_v44  ;;  %v1690_v59 = vpop.f32.mrf.mxu0  ;;  %v2300_v58 = vsel %vm971_vm1, %v2269_v35, 0 }
 0x113   :  { %1816 = vmatprep.subr.msk.bf16.mxu1 %vm971_vm1, %v2132_v40  ;;  %1822 = vmatprep.subr.msk.bf16.mxu0 %vm971_vm1, %v2228_v57  ;;  %v658_v61 = vadd.f32 %v1690_v59, %v2237_v46 }
 0x114   :  { %v649_v62 = vpop.f32.mrf.mxu0 }
 0x115   :  { %778 = vst [vmem:[#allocation2 + $0x10] sm:$0xff] %v658_v61  ;;  %v650_v0 = vadd.f32 %v2237_v46, %v649_v62  ;;  %887 = vperm.xlu1 %1839, %v658_v61  }
 0x116   :  { %v1691_v1 = vpop.f32.mrf.mxu0 }
 0x117   :  { %776 = vst [vmem:[#allocation2] sm:$0xff] %v650_v0  ;;  %v661_v7 = vadd.f32 %v1691_v1, %v2237_v46  ;;  %877 = vperm.xlu0 %1840, %v650_v0  }
 0x118   :  { %v652_v10 = vpop.f32.mrf.mxu0 }
 0x119   :  { %779 = vst [vmem:[#allocation2 + $0x18] sm:$0xff] %v661_v7  ;;  %v653_v13 = vadd.f32 %v2237_v46, %v652_v10  ;;  %892 = vperm.xlu1 %1839, %v661_v7  }
 0x11a   :  { %1733 = vmatpush3.bf16.xpose.msra.mxu1 %v1000_v12  ;;  %1757 = vmatpush3.bf16.xpose.msra.mxu0 %v2251_v5  ;;  %v1694_v24 = vpop.f32.mrf.mxu0 }
 0x11b   :  { %1817 = vmatprep.subr.msk.bf16.mxu1 %vm971_vm1, %v2134_v42  ;;  %1824 = vmatprep.subr.msk.bf16.mxu0 %vm971_vm1, %v2247_v2  ;;  %777 = vst [vmem:[#allocation2 + $0x8] sm:$0xff] %v653_v13  ;;  %v674_v25 = vadd.f32 %v1694_v24, %v2237_v46 }
 0x11c   :  { %v665_v26 = vpop.f32.mrf.mxu0  ;;  %882 = vperm.xlu0 %1840, %v653_v13   ;;  %v2350_v13 = vsel %vm971_vm1, %v2166_v9, 0 }
 0x11d   :  { %782 = vst [vmem:[#allocation2 + $0x30] sm:$0xff] %v674_v25  ;;  %v666_v40 = vadd.f32 %v2237_v46, %v665_v26 }
 0x11e   :  { %v1695_v29 = vpop.f32.mrf.mxu0 }
 0x11f   :  { %780 = vst [vmem:[#allocation2 + $0x20] sm:$0xff] %v666_v40  ;;  %v677_v31 = vadd.f32 %v1695_v29, %v2237_v46 }
 0x120   :  { %v668_v33 = vpop.f32.mrf.mxu0  ;;  %907 = vperm.xlu0 %1840, %v674_v25  }
 0x121   :  { %783 = vst [vmem:[#allocation2 + $0x38] sm:$0xff] %v677_v31  ;;  %v669_v37 = vadd.f32 %v2237_v46, %v668_v33  ;;  %912 = vperm.xlu1 %1839, %v677_v31  }
 0x122   :  { %1735 = vmatpush3.bf16.xpose.msra.mxu1 %v997_v34  ;;  %1759 = vmatpush3.bf16.xpose.msra.mxu0 %v2273_v36  ;;  %v1698_v47 = vpop.f32.mrf.mxu0 }
 0x123   :  { %1826 = vmatprep.subr.msk.bf16.mxu0 %vm971_vm1, %v2269_v35  ;;  %1819 = vmatprep.subr.msk.bf16.mxu1 %vm971_vm1, %v2210_v51  ;;  %781 = vst [vmem:[#allocation2 + $0x28] sm:$0xff] %v669_v37  ;;  %v690_v42 = vadd.f32 %v1698_v47, %v2237_v46  ;;  %v2292_v51 = vpack.c.bf16 %v2188_v22, %v2180_v18  ;;  %v2314_v18 = vpop.f32.mrf.mxu1 }
 0x124   :  { %v681_v15 = vpop.f32.mrf.mxu0  ;;  %897 = vperm.xlu0 %1840, %v666_v40   ;;  %v1254_v40 = vsel %vm971_vm1, %v2171_v14, 0  ;;  %v869_v33 = vpack.c.bf16 %v2314_v18, %v2285_v48 }
 0x125   :  { %786 = vst [vmem:[#allocation2 + $0x50] sm:$0xff] %v690_v42  ;;  %v682_v20 = vadd.f32 %v2237_v46, %v681_v15  ;;  %902 = vperm.xlu1 %1839, %v669_v37   ;;  %v2319_v62 = vpop.f32.mrf.mxu1  ;;  %v2327_v0 = vsel %vm971_vm1, %v2292_v51, 0 }
 0x126   :  { %v1699_v49 = vpop.f32.mrf.mxu0 }
 0x127   :  { %784 = vst [vmem:[#allocation2 + $0x40] sm:$0xff] %v682_v20  ;;  %v693_v43 = vadd.f32 %v1699_v49, %v2237_v46  ;;  %v497_v3 = vpop.f32.mrf.mxu1 }
 0x128   :  { %v684_v52 = vpop.f32.mrf.mxu0  ;;  %927 = vperm.xlu0 %1840, %v690_v42  }
 0x129   :  { %1737 = vmatmul.mubr.msk.bf16.vlgmr.msra.gmra.mxu1 %vm971_vm1, %v860_v55  ;;  %787 = vst [vmem:[#allocation2 + $0x58] sm:$0xff] %v693_v43  ;;  %v685_v59 = vadd.f32 %v2237_v46, %v684_v52  ;;  %932 = vperm.xlu1 %1839, %v693_v43   ;;  %v2342_v10 = vpop.f32.mrf.mxu1 }
 0x12a   :  { %1792 = vmatpush3.bf16.xpose.msra.mxu1 %v2220_v53  ;;  %1761 = vmatpush3.bf16.xpose.msra.mxu0 %v2300_v58  ;;  %v1702_v6 = vpop.f32.mrf.mxu0 }
 0x12b   :  { %1821 = vmatprep.subr.msk.bf16.mxu1 %vm971_vm1, %v2222_v56  ;;  %1828 = vmatprep.subr.msk.bf16.mxu0 %vm971_vm1, %v2292_v51  ;;  %785 = vst [vmem:[#allocation2 + $0x48] sm:$0xff] %v685_v59  ;;  %v706_v50 = vadd.f32 %v1702_v6, %v2237_v46  ;;  %v863_v56 = vpack.c.bf16 %v2182_v19, %v2168_v11  ;;  %v500_v16 = vpop.f32.mrf.mxu1 }
 0x12c   :  { %1740 = vmatprep.mubr.msk.bf16.mxu1 %vm971_vm1, %v861_v45  ;;  %v697_v54 = vpop.f32.mrf.mxu0  ;;  %917 = vperm.xlu0 %1840, %v682_v20   ;;  %v871_v25 = vpack.c.bf16 %v500_v16, %v497_v3 }
 0x12d   :  { %790 = vst [vmem:[#allocation2 + $0x70] sm:$0xff] %v706_v50  ;;  %v698_v55 = vadd.f32 %v2237_v46, %v697_v54  ;;  %922 = vperm.xlu1 %1839, %v685_v59   ;;  %v1670_v41 = vpop.f32.mrf.mxu1 }
 0x12e   :  { %v1703_v22 = vpop.f32.mrf.mxu0 }
 0x12f   :  { %788 = vst [vmem:[#allocation2 + $0x60] sm:$0xff] %v698_v55  ;;  %v709_v53 = vadd.f32 %v1703_v22, %v2237_v46  ;;  %v513_v43 = vpop.f32.mrf.mxu1 }
 0x130   :  { %v700_v61 = vpop.f32.mrf.mxu0  ;;  %947 = vperm.xlu0 %1840, %v706_v50  }
 0x131   :  { %1741 = vmatmul.mubr.msk.bf16.gmra.mxu1 %vm971_vm1, %v862_v4  ;;  %791 = vst [vmem:[#allocation2 + $0x78] sm:$0xff] %v709_v53  ;;  %v701_v1 = vadd.f32 %v2237_v46, %v700_v61  ;;  %952 = vperm.xlu1 %1839, %v709_v53   ;;  %v1671_v45 = vpop.f32.mrf.mxu1 }
 0x132   :  { %1793 = vmatpush3.bf16.xpose.msra.mxu1 %v2232_v44  ;;  %1763 = vmatpush3.bf16.xpose.msra.mxu0 %v2327_v0  ;;  %v1706_v11 = vpop.f32.mrf.mxu0 }
 0x133   :  { %1823 = vmatprep.subr.msk.bf16.mxu1 %vm971_vm1, %v2228_v57  ;;  %1830 = vmatprep.subr.msk.bf16.mxu0 %vm971_vm1, %v2166_v9  ;;  %789 = vst [vmem:[#allocation2 + $0x68] sm:$0xff] %v701_v1  ;;  %v722_v60 = vadd.f32 %v1706_v11, %v2237_v46  ;;  %v865_v57 = vpack.c.bf16 %v2198_v30, %v2190_v23  ;;  %v516_v52 = vpop.f32.mrf.mxu1 }
 0x134   :  { %1744 = vmatprep.mubr.msk.bf16.mxu1 %vm971_vm1, %v863_v56  ;;  %v713_v4 = vpop.f32.mrf.mxu0  ;;  %937 = vperm.xlu0 %1840, %v698_v55  }
 0x135   :  { %794 = vst [vmem:[#allocation2 + $0x90] sm:$0xff] %v722_v60  ;;  %v714_v19 = vadd.f32 %v2237_v46, %v713_v4  ;;  %942 = vperm.xlu1 %1839, %v701_v1  }
 0x136   :  { %v1707_v44 = vpop.f32.mrf.mxu0 }
 0x137   :  { %792 = vst [vmem:[#allocation2 + $0x80] sm:$0xff] %v714_v19  ;;  %v725_v7 = vadd.f32 %v1707_v44, %v2237_v46 }
 0x138   :  { %v716_v12 = vpop.f32.mrf.mxu0  ;;  %1145 = vperm.xlu0 %1840, %v722_v60  }
 0x139   :  { %1745 = vmatmul.mubr.msk.bf16.gmra.mxu1 %vm971_vm1, %v864_v17  ;;  %795 = vst [vmem:[#allocation2 + $0x98] sm:$0xff] %v725_v7  ;;  %v717_v24 = vadd.f32 %v2237_v46, %v716_v12  ;;  %1150 = vperm.xlu1 %1839, %v725_v7  }
 0x13a   :  { %1794 = vmatpush3.bf16.xpose.msra.mxu1 %v2251_v5  ;;  %1765 = vmatpush3.bf16.xpose.msra.mxu0 %v2350_v13  ;;  %v1710_v23 = vpop.f32.mrf.mxu0 }
 0x13b   :  { %1825 = vmatprep.subr.msk.bf16.mxu1 %vm971_vm1, %v2247_v2  ;;  %1832 = vmatprep.subr.msk.bf16.mxu0 %vm971_vm1, %v2171_v14  ;;  %793 = vst [vmem:[#allocation2 + $0x88] sm:$0xff] %v717_v24  ;;  %v738_v8 = vadd.f32 %v1710_v23, %v2237_v46 }
 0x13c   :  { %1748 = vmatprep.mubr.msk.bf16.mxu1 %vm971_vm1, %v865_v57  ;;  %v729_v17 = vpop.f32.mrf.mxu0  ;;  %1135 = vperm.xlu0 %1840, %v714_v19  }
 0x13d   :  { %798 = vst [vmem:[#allocation2 + $0xb0] sm:$0xff] %v738_v8  ;;  %v730_v30 = vadd.f32 %v2237_v46, %v729_v17  ;;  %1140 = vperm.xlu1 %1839, %v717_v24  }
 0x13e   :  { %v1711_v5 = vpop.f32.mrf.mxu0 }
 0x13f   :  { %796 = vst [vmem:[#allocation2 + $0xa0] sm:$0xff] %v730_v30  ;;  %v741_v2 = vadd.f32 %v1711_v5, %v2237_v46 }
 0x140   :  { %v732_v26 = vpop.f32.mrf.mxu0  ;;  %1165 = vperm.xlu0 %1840, %v738_v8  }
 0x141   :  { %1749 = vmatmul.mubr.msk.bf16.gmra.mxu1 %vm971_vm1, %v866_v28  ;;  %799 = vst [vmem:[#allocation2 + $0xb8] sm:$0xff] %v741_v2  ;;  %v733_v29 = vadd.f32 %v2237_v46, %v732_v26  ;;  %1170 = vperm.xlu1 %1839, %v741_v2  }
 0x142   :  { %1795 = vmatpush3.bf16.xpose.msra.mxu1 %v2273_v36  ;;  %1767 = vmatpush3.bf16.xpose.msra.mxu0 %v1254_v40  ;;  %v1714_v31 = vpop.f32.mrf.mxu0 }
 0x143   :  { %1827 = vmatprep.subr.msk.bf16.mxu1 %vm971_vm1, %v2269_v35  ;;  %1776 = vmatprep.mubr.msk.bf16.mxu1 %vm971_vm1, %v871_v25  ;;  %797 = vst [vmem:[#allocation2 + $0xa8] sm:$0xff] %v733_v29  ;;  %v754_v21 = vadd.f32 %v1714_v31, %v2237_v46 }
 0x144   :  { %v745_v27 = vpop.f32.mrf.mxu0  ;;  %1155 = vperm.xlu0 %1840, %v730_v30  }
 0x145   :  { %802 = vst [vmem:[#allocation2 + $0xd0] sm:$0xff] %v754_v21  ;;  %v746_v28 = vadd.f32 %v2237_v46, %v745_v27  ;;  %1160 = vperm.xlu1 %1839, %v733_v29  }
 0x146   :  { %v1715_v34 = vpop.f32.mrf.mxu0 }
 0x147   :  { %800 = vst [vmem:[#allocation2 + $0xc0] sm:$0xff] %v746_v28  ;;  %v757_v36 = vadd.f32 %v1715_v34, %v2237_v46 }
 0x148   :  { %v748_v37 = vpop.f32.mrf.mxu0  ;;  %1185 = vperm.xlu0 %1840, %v754_v21  }
 0x149   :  { %1769 = vmatmul.mubr.msk.bf16.vlgmr.msra.gmra.mxu0 %vm971_vm1, %v868_v39  ;;  %803 = vst [vmem:[#allocation2 + $0xd8] sm:$0xff] %v757_v36  ;;  %v749_v35 = vadd.f32 %v2237_v46, %v748_v37  ;;  %1190 = vperm.xlu1 %1839, %v757_v36  }
 0x14a   :  { %1796 = vmatpush3.bf16.xpose.msra.mxu1 %v2300_v58  ;;  %1772 = vmatprep.mubr.msk.bf16.mxu0 %vm971_vm1, %v869_v33  ;;  %v1718_v47 = vpop.f32.mrf.mxu0 }
 0x14b   :  { %1829 = vmatprep.subr.msk.bf16.mxu1 %vm971_vm1, %v2292_v51  ;;  %801 = vst [vmem:[#allocation2 + $0xc8] sm:$0xff] %v749_v35  ;;  %v770_v42 = vadd.f32 %v1718_v47, %v2237_v46  ;;  %v872_v51 = vpack.c.bf16 %v2342_v10, %v2319_v62 }
 0x14c   :  { %v761_v15 = vpop.f32.mrf.mxu0  ;;  %1175 = vperm.xlu0 %1840, %v746_v28  }
 0x14d   :  { %806 = vst [vmem:[#allocation2 + $0xf0] sm:$0xff] %v770_v42  ;;  %v762_v38 = vadd.f32 %v2237_v46, %v761_v15  ;;  %1180 = vperm.xlu1 %1839, %v749_v35  }
 0x14e   :  { %v1719_v39 = vpop.f32.mrf.mxu0 }
 0x14f   :  { %804 = vst [vmem:[#allocation2 + $0xe0] sm:$0xff] %v762_v38  ;;  %v773_v20 = vadd.f32 %v1719_v39, %v2237_v46 }
 0x150   :  { %v764_v48 = vpop.f32.mrf.mxu0  ;;  %1195 = vperm.xlu0 %1840, %v762_v38  }
 0x151   :  { %1773 = vmatmul.mubr.msk.bf16.gmra.mxu0 %vm971_vm1, %v870_v32  ;;  %807 = vst [vmem:[#allocation2 + $0xf8] sm:$0xff] %v773_v20  ;;  %v765_v49 = vadd.f32 %v2237_v46, %v764_v48  ;;  %v873_v46 = vpack.c.bf16 %v516_v52, %v513_v43 }
 0x152   :  { %1797 = vmatpush3.bf16.xpose.msra.mxu1 %v2327_v0 }
 0x153   :  { %1831 = vmatprep.subr.msk.bf16.mxu1 %vm971_vm1, %v2166_v9  ;;  %805 = vst [vmem:[#allocation2 + $0xe8] sm:$0xff] %v765_v49  ;;  %1200 = vperm.xlu1 %1839, %v765_v49   ;;  %v874_v9 = vpack.c.bf16 %v1671_v45, %v1670_v41 }
 0x154   :  { %1205 = vperm.xlu0 %1840, %v770_v42  }
 0x157   :  { %1210 = vperm.xlu1 %1839, %v773_v20  }
 0x15a   :  { %1798 = vmatpush3.bf16.xpose.msra.mxu1 %v2350_v13 }
 0x15b   :  { %1833 = vmatprep.subr.msk.bf16.mxu1 %vm971_vm1, %v2171_v14 }
 0x162   :  { %1799 = vmatpush3.bf16.xpose.msra.mxu1 %v1254_v40 }
 0x169   :  { %1777 = vmatmul.mubr.msk.bf16.vlgmr.msra.gmra.mxu1 %vm971_vm1, %v872_v51 }
 0x16a   :  { %1780 = vmatprep.mubr.msk.bf16.mxu1 %vm971_vm1, %v873_v46 }
 0x171   :  { %1781 = vmatmul.mubr.msk.bf16.gmra.mxu1 %vm971_vm1, %v874_v9 }
 0x172   :  { %1878 = shalt.err (!%p1875_p4)
}
 0x173   :  { %s1913_s23 = smov 128   ;;  %s1914_s24 = smov 8   ;;  %v808_v63 = vlaneseq }
 0x174   :  { %1402 = dma.vmem_to_hbm [thread:$0]  %s1397_s21, 4096, %s2600_s5, [#allocation3], %s1913_s23, %s1913_s23, %s1914_s24  }
 0x175   :  { %v2412_v50 = vshrl.u32 %v808_v63, 7  ;;  %v2417_v18 = vand.u32 127, %v808_v63  ;;  %s1915_s5 = smov [#allocation4]  }
 0x176   :  { %s1408_s1 = sshll.u32 %s1915_s5, 4  ;;  %s1409_s1 = int_to_ptr.vmem [resolvable:$true] %s1408_s1 }
 0x177   :  { %v2415_v55 = vadd.s32 16, %v2412_v50  ;;  %v2422_v56 = vadd.s32 24, %v2412_v50  ;;  %vm827_vm3 = vcmp.eq.s32.totalorder %v2412_v50, %v2417_v18  ;;  %v2427_v61 = vadd.s32 8, %v2412_v50  ;;  %s1887_s27 = scalar_lea.vmem %s1409_s1, 4096  ;;  %p1892_p6 = scmp.lt.s32.totalorder %s1409_s1, %s1409_s1 }
 0x178   :  { %v2435_v1 = vadd.s32 48, %v2412_v50  ;;  %v2443_v4 = vadd.s32 32, %v2412_v50  ;;  %v2449_v57 = vadd.s32 56, %v2412_v50  ;;  %v2457_v23 = vadd.s32 40, %v2412_v50  ;;  %p1888_p5 = scmp.ne.s32.totalorder %s1409_s1, %s1887_s27  ;;  %p1893_p7 = scmp.lt.s32.totalorder %s1887_s27, %s1887_s27 }
 0x179   :  { %vm829_vm2 = vcmp.eq.s32.totalorder %v2415_v55, %v2417_v18  ;;  %vm830_vm4 = vcmp.eq.s32.totalorder %v2422_v56, %v2417_v18  ;;  %vm828_vm5 = vcmp.eq.s32.totalorder %v2427_v61, %v2417_v18  ;;  %v2467_v5 = vadd.s32 80, %v2412_v50 }
 0x17a   :  { %vm833_vm6 = vcmp.eq.s32.totalorder %v2435_v1, %v2417_v18  ;;  %vm831_vm7 = vcmp.eq.s32.totalorder %v2443_v4, %v2417_v18  ;;  %vm834_vm8 = vcmp.eq.s32.totalorder %v2449_v57, %v2417_v18  ;;  %vm832_vm9 = vcmp.eq.s32.totalorder %v2457_v23, %v2417_v18  ;;  %p1894_p8 = por %p1893_p7, %p1892_p6 }
 0x17b   :  { %v2475_v29 = vadd.s32 64, %v2412_v50  ;;  %vm837_vm10 = vcmp.eq.s32.totalorder %v2467_v5, %v2417_v18  ;;  %v2486_v37 = vadd.s32 88, %v2412_v50  ;;  %v2494_v15 = vadd.s32 72, %v2412_v50 }
 0x17c   :  { %v2502_v48 = vadd.s32 112, %v2412_v50  ;;  %v2507_v45 = vadd.s32 96, %v2412_v50  ;;  %v2513_v9 = vadd.s32 120, %v2412_v50  ;;  %p1895_p9 = pnand %p1894_p8, %p1888_p5 }
 0x17d   :  { %vm835_vm11 = vcmp.eq.s32.totalorder %v2475_v29, %v2417_v18  ;;  %vm838_vm12 = vcmp.eq.s32.totalorder %v2486_v37, %v2417_v18  ;;  %vm836_vm13 = vcmp.eq.s32.totalorder %v2494_v15, %v2417_v18 }
 0x17e   :  { %vm841_vm14 = vcmp.eq.s32.totalorder %v2502_v48, %v2417_v18  ;;  %vm839_vm15 = vcmp.eq.s32.totalorder %v2507_v45, %v2417_v18  ;;  %vm842_vm0 = vcmp.eq.s32.totalorder %v2513_v9, %v2417_v18 }
 0x190   :  { %v888_v58 = vpop.permute.xlu1 %887 }
 0x191   :  { %v957_v0 = vsel %vm829_vm2, %v888_v58, 0.0 }
 0x192   :  { %v878_v14 = vpop.permute.xlu0 %877 }
 0x193   :  { %v955_v60 = vsel %vm827_vm3, %v878_v14, 0.0 }
 0x194   :  { %v893_v6 = vpop.permute.xlu1 %892 }
 0x195   :  { %v958_v44 = vsel %vm830_vm4, %v893_v6, 0.0  ;;  %v2521_v6 = vadd.s32 104, %v2412_v50 }
 0x197   :  { %v883_v59 = vpop.permute.xlu0 %882  ;;  %vm840_vm1 = vcmp.eq.s32.totalorder %v2521_v6, %v2417_v18 }
 0x198   :  { %v956_v13 = vsel %vm828_vm5, %v883_v59, 0.0 }
 0x19b   :  { %v908_v54 = vpop.permute.xlu0 %907 }
 0x19c   :  { %v913_v22 = vpop.permute.xlu1 %912  ;;  %v961_v17 = vsel %vm833_vm6, %v908_v54, 0.0 }
 0x19d   :  { %v962_v21 = vsel %vm834_vm8, %v913_v22, 0.0 }
 0x19f   :  { %v898_v53 = vpop.permute.xlu0 %897 }
 0x1a0   :  { %v903_v62 = vpop.permute.xlu1 %902  ;;  %v959_v2 = vsel %vm831_vm7, %v898_v53, 0.0 }
 0x1a1   :  { %v960_v34 = vsel %vm832_vm9, %v903_v62, 0.0 }
 0x1a3   :  { %v928_v11 = vpop.permute.xlu0 %927 }
 0x1a4   :  { %v933_v10 = vpop.permute.xlu1 %932  ;;  %v965_v47 = vsel %vm837_vm10, %v928_v11, 0.0 }
 0x1a5   :  { %v966_v46 = vsel %vm838_vm12, %v933_v10, 0.0 }
 0x1a7   :  { %v918_v8 = vpop.permute.xlu0 %917 }
 0x1a8   :  { %v923_v40 = vpop.permute.xlu1 %922  ;;  %v963_v39 = vsel %vm835_vm11, %v918_v8, 0.0 }
 0x1a9   :  { %v964_v59 = vsel %vm836_vm13, %v923_v40, 0.0 }
 0x1ab   :  { %v948_v28 = vpop.permute.xlu0 %947 }
 0x1ac   :  { %v953_v32 = vpop.permute.xlu1 %952  ;;  %v969_v53 = vsel %vm841_vm14, %v948_v28, 0.0 }
 0x1af   :  { %v938_v49 = vpop.permute.xlu0 %937 }
 0x1b0   :  { %v943_v14 = vpop.permute.xlu1 %942  ;;  %v967_v11 = vsel %vm839_vm15, %v938_v49, 0.0 }
 0x1b3   :  { %v1146_v54 = vpop.permute.xlu0 %1145 }
 0x1b7   :  { %v1136_v10 = vpop.permute.xlu0 %1135 }
 0x1bb   :  { %v1166_v40 = vpop.permute.xlu0 %1165 }
 0x1e9   :  { %v1738_v3 = vpop.f32.mrf.mxu1 }
 0x1ea   :  { %v1063_v19 = vadd.f32 %v1738_v3, %v957_v0  ;;  %v1151_v3 = vpop.permute.xlu1 %1150 }
 0x1eb   :  { %v1054_v7 = vpop.f32.mrf.mxu1 }
 0x1ec   :  { %1119 = vst [vmem:[#allocation4 + $0x10] sm:$0xff] %v1063_v19  ;;  %v1055_v12 = vadd.f32 %v1054_v7, %v955_v60 }
 0x1ed   :  { %v1739_v24 = vpop.f32.mrf.mxu1 }
 0x1ee   :  { %1117 = vst [vmem:[#allocation4] sm:$0xff] %v1055_v12  ;;  %v1066_v16 = vadd.f32 %v1739_v24, %v958_v44  ;;  %v970_v44 = vsel %vm842_vm0, %v953_v32, 0.0 }
 0x1ef   :  { %v1057_v30 = vpop.f32.mrf.mxu1 }
 0x1f0   :  { %1120 = vst [vmem:[#allocation4 + $0x18] sm:$0xff] %v1066_v16  ;;  %v1058_v25 = vadd.f32 %v1057_v30, %v956_v13  ;;  %v968_v13 = vsel %vm840_vm1, %v943_v14, 0.0  ;;  %v1215_v16 = vsel %vm829_vm2, %v1146_v54, 0.0  ;;  %v1141_v30 = vpop.permute.xlu1 %1140 }
 0x1f1   :  { %v1742_v26 = vpop.f32.mrf.mxu1  ;;  %v1214_v28 = vsel %vm828_vm5, %v1141_v30, 0.0 }
 0x1f2   :  { %1118 = vst [vmem:[#allocation4 + $0x8] sm:$0xff] %v1058_v25  ;;  %v1079_v31 = vadd.f32 %v1742_v26, %v961_v17 }
 0x1f3   :  { %v1070_v27 = vpop.f32.mrf.mxu1 }
 0x1f4   :  { %1123 = vst [vmem:[#allocation4 + $0x30] sm:$0xff] %v1079_v31  ;;  %v1071_v33 = vadd.f32 %v1070_v27, %v959_v2  ;;  %v1213_v2 = vsel %vm827_vm3, %v1136_v10, 0.0 }
 0x1f5   :  { %v1743_v36 = vpop.f32.mrf.mxu1 }
 0x1f6   :  { %1121 = vst [vmem:[#allocation4 + $0x20] sm:$0xff] %v1071_v33  ;;  %v1082_v35 = vadd.f32 %v1743_v36, %v962_v21  ;;  %v1216_v21 = vsel %vm830_vm4, %v1151_v3, 0.0  ;;  %v1219_v36 = vsel %vm833_vm6, %v1166_v40, 0.0 }
 0x1f7   :  { %v1073_v42 = vpop.f32.mrf.mxu1 }
 0x1f8   :  { %1124 = vst [vmem:[#allocation4 + $0x38] sm:$0xff] %v1082_v35  ;;  %v1074_v38 = vadd.f32 %v1073_v42, %v960_v34  ;;  %v1171_v34 = vpop.permute.xlu1 %1170 }
 0x1f9   :  { %v1746_v20 = vpop.f32.mrf.mxu1 }
 0x1fa   :  { %1122 = vst [vmem:[#allocation4 + $0x28] sm:$0xff] %v1074_v38  ;;  %v1095_v41 = vadd.f32 %v1746_v20, %v965_v47  ;;  %v1156_v47 = vpop.permute.xlu0 %1155  ;;  %v1220_v38 = vsel %vm834_vm8, %v1171_v34, 0.0 }
 0x1fb   :  { %v1086_v43 = vpop.f32.mrf.mxu1  ;;  %v1217_v42 = vsel %vm831_vm7, %v1156_v47, 0.0 }
 0x1fc   :  { %1127 = vst [vmem:[#allocation4 + $0x50] sm:$0xff] %v1095_v41  ;;  %v1087_v52 = vadd.f32 %v1086_v43, %v963_v39  ;;  %v1161_v20 = vpop.permute.xlu1 %1160 }
 0x1fd   :  { %v1747_v51 = vpop.f32.mrf.mxu1  ;;  %v1218_v49 = vsel %vm832_vm9, %v1161_v20, 0.0 }
 0x1fe   :  { %1125 = vst [vmem:[#allocation4 + $0x40] sm:$0xff] %v1087_v52  ;;  %v1098_v58 = vadd.f32 %v1747_v51, %v966_v46  ;;  %v1186_v4 = vpop.permute.xlu0 %1185 }
 0x1ff   :  { %v1089_v63 = vpop.f32.mrf.mxu1  ;;  %v1223_v57 = vsel %vm837_vm10, %v1186_v4, 0.0 }
 0x200   :  { %1128 = vst [vmem:[#allocation4 + $0x58] sm:$0xff] %v1098_v58  ;;  %v1090_v22 = vadd.f32 %v1089_v63, %v964_v59  ;;  %v1191_v52 = vpop.permute.xlu1 %1190 }
 0x201   :  { %v1750_v62 = vpop.f32.mrf.mxu1 }
 0x202   :  { %1126 = vst [vmem:[#allocation4 + $0x48] sm:$0xff] %v1090_v22  ;;  %v1111_v0 = vadd.f32 %v1750_v62, %v969_v53  ;;  %v1176_v46 = vpop.permute.xlu0 %1175  ;;  %v1224_v53 = vsel %vm838_vm12, %v1191_v52, 0.0 }
 0x203   :  { %v1102_v60 = vpop.f32.mrf.mxu1  ;;  %v1221_v23 = vsel %vm835_vm11, %v1176_v46, 0.0 }
 0x204   :  { %1131 = vst [vmem:[#allocation4 + $0x70] sm:$0xff] %v1111_v0  ;;  %v1103_v19 = vadd.f32 %v1102_v60, %v967_v11  ;;  %v1181_v51 = vpop.permute.xlu1 %1180 }
 0x205   :  { %v1751_v7 = vpop.f32.mrf.mxu1  ;;  %v1222_v5 = vsel %vm836_vm13, %v1181_v51, 0.0 }
 0x206   :  { %1129 = vst [vmem:[#allocation4 + $0x60] sm:$0xff] %v1103_v19  ;;  %v1114_v12 = vadd.f32 %v1751_v7, %v970_v44  ;;  %v1196_v14 = vpop.permute.xlu0 %1195 }
 0x207   :  { %v1105_v24 = vpop.f32.mrf.mxu1  ;;  %v1225_v7 = vsel %vm839_vm15, %v1196_v14, 0.0 }
 0x208   :  { %1132 = vst [vmem:[#allocation4 + $0x78] sm:$0xff] %v1114_v12  ;;  %v1106_v8 = vadd.f32 %v1105_v24, %v968_v13  ;;  %v1201_v54 = vpop.permute.xlu1 %1200 }
 0x209   :  { %v1770_v17 = vpop.f32.mrf.mxu0  ;;  %v1226_v24 = vsel %vm840_vm1, %v1201_v54, 0.0 }
 0x20a   :  { %1130 = vst [vmem:[#allocation4 + $0x68] sm:$0xff] %v1106_v8  ;;  %v1320_v25 = vadd.f32 %v1770_v17, %v1215_v16  ;;  %v1206_v0 = vpop.permute.xlu0 %1205 }
 0x20b   :  { %v1311_v26 = vpop.f32.mrf.mxu0  ;;  %v1227_v3 = vsel %vm841_vm14, %v1206_v0, 0.0 }
 0x20c   :  { %1377 = vst [vmem:[#allocation4 + $0x90] sm:$0xff] %v1320_v25  ;;  %v1312_v31 = vadd.f32 %v1311_v26, %v1213_v2  ;;  %v1211_v44 = vpop.permute.xlu1 %1210 }
 0x20d   :  { %v1771_v27 = vpop.f32.mrf.mxu0  ;;  %v1228_v15 = vsel %vm842_vm0, %v1211_v44, 0.0 }
 0x20e   :  { %1375 = vst [vmem:[#allocation4 + $0x80] sm:$0xff] %v1312_v31  ;;  %v1323_v55 = vadd.f32 %v1771_v27, %v1216_v21 }
 0x20f   :  { %v1314_v33 = vpop.f32.mrf.mxu0 }
 0x210   :  { %1378 = vst [vmem:[#allocation4 + $0x98] sm:$0xff] %v1323_v55  ;;  %v1315_v50 = vadd.f32 %v1314_v33, %v1214_v28 }
 0x211   :  { %v1774_v35 = vpop.f32.mrf.mxu0 }
 0x212   :  { %1376 = vst [vmem:[#allocation4 + $0x88] sm:$0xff] %v1315_v50  ;;  %v1336_v56 = vadd.f32 %v1774_v35, %v1219_v36 }
 0x213   :  { %v1327_v32 = vpop.f32.mrf.mxu0 }
 0x214   :  { %1381 = vst [vmem:[#allocation4 + $0xb0] sm:$0xff] %v1336_v56  ;;  %v1328_v61 = vadd.f32 %v1327_v32, %v1217_v42 }
 0x215   :  { %v1775_v39 = vpop.f32.mrf.mxu0 }
 0x216   :  { %1379 = vst [vmem:[#allocation4 + $0xa0] sm:$0xff] %v1328_v61  ;;  %v1339_v1 = vadd.f32 %v1775_v39, %v1220_v38 }
 0x217   :  { %v1330_v41 = vpop.f32.mrf.mxu0 }
 0x218   :  { %1382 = vst [vmem:[#allocation4 + $0xb8] sm:$0xff] %v1339_v1  ;;  %v1331_v43 = vadd.f32 %v1330_v41, %v1218_v49 }
 0x21a   :  { %1380 = vst [vmem:[#allocation4 + $0xa8] sm:$0xff] %v1331_v43 }
 0x229   :  { %v1778_v58 = vpop.f32.mrf.mxu1 }
 0x22a   :  { %v1352_v59 = vadd.f32 %v1778_v58, %v1223_v57 }
 0x22b   :  { %v1343_v63 = vpop.f32.mrf.mxu1 }
 0x22c   :  { %1385 = vst [vmem:[#allocation4 + $0xd0] sm:$0xff] %v1352_v59  ;;  %v1344_v22 = vadd.f32 %v1343_v63, %v1221_v23 }
 0x22d   :  { %v1779_v62 = vpop.f32.mrf.mxu1 }
 0x22e   :  { %1383 = vst [vmem:[#allocation4 + $0xc0] sm:$0xff] %v1344_v22  ;;  %v1355_v11 = vadd.f32 %v1779_v62, %v1224_v53 }
 0x22f   :  { %v1346_v60 = vpop.f32.mrf.mxu1 }
 0x230   :  { %1386 = vst [vmem:[#allocation4 + $0xd8] sm:$0xff] %v1355_v11  ;;  %v1347_v29 = vadd.f32 %v1346_v60, %v1222_v5 }
 0x231   :  { %v1782_v19 = vpop.f32.mrf.mxu1 }
 0x232   :  { %1384 = vst [vmem:[#allocation4 + $0xc8] sm:$0xff] %v1347_v29  ;;  %v1368_v37 = vadd.f32 %v1782_v19, %v1227_v3 }
 0x233   :  { %v1359_v10 = vpop.f32.mrf.mxu1 }
 0x234   :  { %1389 = vst [vmem:[#allocation4 + $0xf0] sm:$0xff] %v1368_v37  ;;  %v1360_v12 = vadd.f32 %v1359_v10, %v1225_v7 }
 0x235   :  { %v1783_v13 = vpop.f32.mrf.mxu1 }
 0x236   :  { %1387 = vst [vmem:[#allocation4 + $0xe0] sm:$0xff] %v1360_v12  ;;  %v1371_v48 = vadd.f32 %v1783_v13, %v1228_v15 }
 0x237   :  { %v1362_v8 = vpop.f32.mrf.mxu1 }
 0x238   :  { %1390 = vst [vmem:[#allocation4 + $0xf8] sm:$0xff] %v1371_v48  ;;  %v1363_v45 = vadd.f32 %v1362_v8, %v1226_v24 }
 0x23a   :  { %1388 = vst [vmem:[#allocation4 + $0xe8] sm:$0xff] %v1363_v45 }
 0x23b   :  { %1898 = shalt.err (!%p1895_p9)
}
 0x23c   :  { %1414 = dma.vmem_to_hbm [thread:$0]  %s1409_s1, 4096, %s2601_s6, [#allocation5], %s1913_s23, %s1913_s23, %s1914_s24  }
 0x23d   :  { %1907 = dma.done.wait [#allocation3], 4096  }
 0x23e   :  { %1908 = vsyncadd [#allocation3], 4294963200 }
 0x23f   :  { %1909 = dma.done.wait [#allocation5], 4096  }
 0x240   :  { %1910 = vsyncadd [#allocation5], 4294963200 }
 0x241   :  { %1421 = vsyncpa [#allocation3], 1 }
 0x242   :  { %1422 = vsyncpa [#allocation5], 1 }

</bundles_post_ra>
